<compile_context>
chip_gen: v6e
topology: v6e:2x2x1
jax: 0.10.0
libtpu: 0.0.40
codegen_flags: <defaults>
</compile_context>

<pallas_src>
import functools

import jax
import jax.numpy as jnp
from jax.experimental import pallas as pl
from jax.experimental.pallas import tpu as pltpu


def _round_up(x, m):
    return ((x + m - 1) // m) * m


def _pad2(a, rows, cols):
    return jnp.pad(a, ((0, rows - a.shape[0]), (0, cols - a.shape[1])))


def _pick_tile(n_pad, candidates, min_tiles=1):
    for c in candidates:
        if n_pad % c == 0 and n_pad // c >= min_tiles:
            return c
    return 128  # n_pad is always a multiple of 128


# --------------------------------------------------------------------------
# Kernel 1: fused per-row-tile feature transform
#   HCAT = H @ [W_self | W_neigh]   (one 2*f_out-wide matmul, f32 acc)
#   HS   = HCAT[:, :f_out] + bias   (f32)
#   HW   = HCAT[:, f_out:]          (bf16)
# --------------------------------------------------------------------------
def _feature_kernel(h_ref, w_ref, b_ref, hw_ref, hs_ref, *, f_out_p):
    hcat = jnp.dot(h_ref[...], w_ref[...], preferred_element_type=jnp.float32)
    hs_ref[...] = hcat[:, :f_out_p] + b_ref[...]
    hw_ref[...] = hcat[:, f_out_p:].astype(hw_ref.dtype)


def feature_transform(h, w_cat, bias, *, f_out_p, tm):
    n_pad, f_in_p = h.shape
    two_f_out = w_cat.shape[1]
    kernel = functools.partial(_feature_kernel, f_out_p=f_out_p)
    return pl.pallas_call(
        kernel,
        out_shape=(
            jax.ShapeDtypeStruct((n_pad, f_out_p), jnp.bfloat16),  # HW
            jax.ShapeDtypeStruct((n_pad, f_out_p), jnp.float32),   # HS
        ),
        grid=(n_pad // tm,),
        in_specs=[
            pl.BlockSpec((tm, f_in_p), lambda i: (i, 0)),       # H tile (bf16)
            pl.BlockSpec((f_in_p, two_f_out), lambda i: (0, 0)),  # fused W (bf16)
            pl.BlockSpec((1, f_out_p), lambda i: (0, 0)),       # bias (f32)
        ],
        out_specs=(
            pl.BlockSpec((tm, f_out_p), lambda i: (i, 0)),
            pl.BlockSpec((tm, f_out_p), lambda i: (i, 0)),
        ),
        compiler_params=pltpu.CompilerParams(
            dimension_semantics=("parallel",),
            vmem_limit_bytes=32 * 1024 * 1024,
        ),
    )(h, w_cat, bias)


# --------------------------------------------------------------------------
# Kernel 2: tiled aggregation
#   out = (1/deg) * (A @ HW) + HS   (+ ReLU on all but the last layer)
# grid = (N/tm, N/tk); k (reduction over source-node tiles) is the last axis.
# A arrives as int8 0/1 and is widened to bf16 on the VPU before the MXU dot.
# --------------------------------------------------------------------------
def _aggregate_kernel(a_ref, hw_ref, hs_ref, dinv_ref, o_ref, acc_ref, *,
                      tk, apply_relu, hw_resident):
    k = pl.program_id(1)

    @pl.when(k == 0)
    def _init():
        acc_ref[...] = jnp.zeros_like(acc_ref)

    # int8 -> f32 -> bf16 widening rides idle VPU slots in a mem/MXU-bound loop.
    a = a_ref[...].astype(jnp.float32).astype(jnp.bfloat16)
    if hw_resident:
        start = pl.multiple_of(k * tk, tk)
        hw = hw_ref[pl.ds(start, tk), :]
    else:
        hw = hw_ref[...]
    acc_ref[...] += jnp.dot(a, hw, preferred_element_type=jnp.float32)

    @pl.when(k == pl.num_programs(1) - 1)
    def _finalize():
        out = acc_ref[...] * dinv_ref[...] + hs_ref[...]
        if apply_relu:
            out = jnp.maximum(out, 0.0)
        o_ref[...] = out.astype(o_ref.dtype)


def aggregate(a_i8, hw, hs, dinv, *, apply_relu, out_dtype, tm, tk,
              hw_resident):
    n_pad = a_i8.shape[0]
    f_out = hw.shape[1]
    kernel = functools.partial(
        _aggregate_kernel, tk=tk, apply_relu=apply_relu,
        hw_resident=hw_resident)
    if hw_resident:
        # Constant block index -> fetched once, stays VMEM-resident.
        hw_spec = pl.BlockSpec((n_pad, f_out), lambda i, k: (0, 0))
    else:
        hw_spec = pl.BlockSpec((tk, f_out), lambda i, k: (k, 0))
    return pl.pallas_call(
        kernel,
        out_shape=jax.ShapeDtypeStruct((n_pad, f_out), out_dtype),
        grid=(n_pad // tm, n_pad // tk),
        in_specs=[
            pl.BlockSpec((tm, tk), lambda i, k: (i, k)),      # A tile (int8 0/1)
            hw_spec,                                          # HW (bf16)
            pl.BlockSpec((tm, f_out), lambda i, k: (i, 0)),   # HS (f32, epilogue)
            pl.BlockSpec((tm, 1), lambda i, k: (i, 0)),       # 1/deg (f32)
        ],
        out_specs=pl.BlockSpec((tm, f_out), lambda i, k: (i, 0)),
        scratch_shapes=[pltpu.VMEM((tm, f_out), jnp.float32)],
        compiler_params=pltpu.CompilerParams(
            dimension_semantics=("parallel", "arbitrary"),
            vmem_limit_bytes=32 * 1024 * 1024,
        ),
    )(a_i8, hw, hs, dinv)


# --------------------------------------------------------------------------
# Parameters & forward
# --------------------------------------------------------------------------
def make_sage_params(key, in_feats, n_hidden, n_classes, n_layers):
    """Deterministic parameter init matching the SAGE.__init__ layer shapes."""
    dims = []
    if n_layers > 1:
        dims.append((in_feats, n_hidden))
        for _ in range(1, n_layers - 1):
            dims.append((n_hidden, n_hidden))
        dims.append((n_hidden, n_classes))
    else:
        dims.append((in_feats, n_classes))

    params = []
    for (fi, fo) in dims:
        key, k1, k2, k3 = jax.random.split(key, 4)
        scale = 1.0 / jnp.sqrt(jnp.float32(fi))
        w_self = jax.random.uniform(k1, (fi, fo), jnp.float32, -scale, scale)
        w_neigh = jax.random.uniform(k2, (fi, fo), jnp.float32, -scale, scale)
        bias = jax.random.uniform(k3, (1, fo), jnp.float32, -scale, scale)
        params.append((w_self, w_neigh, bias))
    return params


def sage_forward(adj, x, params):
    """SAGE.forward: iterate SAGEConv('mean') layers, ReLU on all but last.

    adj : (N, N) binary adjacency (adj[i, j] = 1 means j is an in-neighbor of i)
    x   : (N, in_feats) node features
    """
    n, in_feats = x.shape
    n_pad = _round_up(n, 128)                    # pad only to lane/sublane tile
    # Aggregate tiles: large k tiles for HBM efficiency; keep >= 2 row tiles so
    # both v7x TensorCores get work on the "parallel" axis.
    tm = _pick_tile(n_pad, (512, 256, 128), min_tiles=2)
    tk = _pick_tile(n_pad, (2048, 1024, 512, 256, 128))
    tm_f = 256 if n_pad % 256 == 0 else 128      # feature-kernel row tile

    # Degree from the raw adjacency; pad A straight into int8 (no f32 padded
    # intermediate). Padded rows/cols of A are zero, so padding never leaks
    # into real rows; dinv for padded rows falls back to 1/max(0,1)=1.
    deg = jnp.sum(adj, axis=1, keepdims=True)
    dinv = jnp.pad(1.0 / jnp.maximum(deg, 1.0),
                   ((0, n_pad - n), (0, 0))).astype(jnp.float32)
    a_i8 = jnp.pad(adj.astype(jnp.int8), ((0, n_pad - n), (0, n_pad - n)))

    # Activations carried in bf16 between layers (f32 MXU accumulation inside).
    h = _pad2(x, n_pad, _round_up(in_feats, 128)).astype(jnp.bfloat16)

    n_layers = len(params)
    for l, (w_self, w_neigh, bias) in enumerate(params):
        f_in, f_out = w_self.shape
        f_in_p = _round_up(f_in, 128)
        f_out_p = _round_up(f_out, 128)

        # Fused [W_self | W_neigh] weight, bf16, padded lane-dense.
        w_cat = jnp.zeros((f_in_p, 2 * f_out_p), jnp.float32)
        w_cat = w_cat.at[:f_in, :f_out].set(w_self)
        w_cat = w_cat.at[:f_in, f_out_p:f_out_p + f_out].set(w_neigh)
        w_cat = w_cat.astype(jnp.bfloat16)
        b_p = _pad2(bias, 1, f_out_p)            # f32

        hw, hs = feature_transform(h, w_cat, b_p, f_out_p=f_out_p, tm=tm_f)

        # Keep HW fully VMEM-resident in the aggregate kernel when it fits a
        # conservative budget (<= 4 MiB, i.e. <= 8 MiB double-buffered).
        hw_resident = (n_pad * f_out_p * 2) <= (4 * 1024 * 1024)
        last = (l == n_layers - 1)
        h = aggregate(
            a_i8, hw, hs, dinv,
            apply_relu=not last,
            out_dtype=jnp.float32 if last else jnp.bfloat16,
            tm=tm, tk=tk, hw_resident=hw_resident,
        )

    n_classes = params[-1][0].shape[1]
    return h[:n, :n_classes]


if __name__ == "__main__":
    # Small deterministic example: N=256 nodes, 64 in-features, 64 hidden,
    # 16 classes, 3 layers -> (2, 1) aggregate grid per layer.
    N = 256
    in_feats = 64
    n_hidden = 64
    n_classes = 16
    n_layers = 3

    key = jax.random.PRNGKey(0)
    k_adj, k_x, k_params = jax.random.split(key, 3)

    adj = (jax.random.uniform(k_adj, (N, N)) < 0.1).astype(jnp.float32)
    x = jax.random.normal(k_x, (N, in_feats), dtype=jnp.float32)
    params = make_sage_params(k_params, in_feats, n_hidden, n_classes, n_layers)

    out = sage_forward(adj, x, params)
    out = jax.block_until_ready(out)

    # Pure-JAX f32 reference (eval-mode SAGEConv 'mean' semantics).
    deg = jnp.sum(adj, axis=1, keepdims=True)
    a_norm = adj / jnp.maximum(deg, 1.0)
    h_ref = x
    for l, (ws, wn, b) in enumerate(params):
        h_ref = h_ref @ ws + (a_norm @ h_ref) @ wn + b
        if l != n_layers - 1:
            h_ref = jnp.maximum(h_ref, 0.0)

    assert out.shape == (N, n_classes), out.shape
    assert out.dtype == jnp.float32
    assert bool(jnp.all(jnp.isfinite(out)))
    max_err = float(jnp.max(jnp.abs(out - h_ref)))
    ref_scale = float(jnp.max(jnp.abs(h_ref))) + 1e-6
    # Activations / weights / HW are carried in bf16 -> allow a few % relative
    # error against the f32 reference.
    assert max_err <= 5e-2 * ref_scale, (max_err, ref_scale)
    print("KERNEL_OK")
</pallas_src>

<mosaic_0001>
module attributes {stable_mosaic.version = 11 : i64} {
  func.func @_feature_kernel(%arg0: i32, %arg1: memref<256x128xbf16, #tpu.memory_space<vmem>>, %arg2: memref<128x256xbf16, #tpu.memory_space<vmem>>, %arg3: memref<1x128xf32, #tpu.memory_space<vmem>>, %arg4: memref<256x128xbf16, #tpu.memory_space<vmem>>, %arg5: memref<256x128xf32, #tpu.memory_space<vmem>>) attributes {dimension_semantics = [#tpu.dimension_semantics<parallel>], iteration_bounds = array<i64: 1>, scalar_prefetch = 0 : i64, scratch_operands = 0 : i64, tpu.core_type = #tpu.core_type<tc>, window_params = [{transform_indices = @transform_0, window_bounds = array<i64: 256, 128>}, {pipeline_mode = #tpu.pipeline_mode<synchronous>, transform_indices = @transform_1, window_bounds = array<i64: 128, 256>}, {pipeline_mode = #tpu.pipeline_mode<synchronous>, transform_indices = @transform_2, window_bounds = array<i64: 1, 128>}, {transform_indices = @transform_3, window_bounds = array<i64: 256, 128>}, {transform_indices = @transform_4, window_bounds = array<i64: 256, 128>}]} {
    %c0 = arith.constant 0 : index
    %c0_0 = arith.constant 0 : index
    %0 = vector.load %arg1[%c0, %c0_0] : memref<256x128xbf16, #tpu.memory_space<vmem>>, vector<256x128xbf16>
    %c0_1 = arith.constant 0 : index
    %c0_2 = arith.constant 0 : index
    %1 = vector.load %arg2[%c0_1, %c0_2] : memref<128x256xbf16, #tpu.memory_space<vmem>>, vector<128x256xbf16>
    %cst = arith.constant dense<0.000000e+00> : vector<256x256xf32>
    %2 = tpu.matmul %0, %1, %cst {dimension_numbers = #tpu.dot_dimension_numbers<[1], [0], [0], [1], [0, 0, 1, 1], [], []>} : vector<256x128xbf16>, vector<128x256xbf16>, vector<256x256xf32> -> vector<256x256xf32>
    %3 = vector.extract_strided_slice %2 {offsets = [0, 0], sizes = [256, 128], strides = [1, 1]} : vector<256x256xf32> to vector<256x128xf32>
    %c0_3 = arith.constant 0 : index
    %c0_4 = arith.constant 0 : index
    %4 = vector.load %arg3[%c0_3, %c0_4] : memref<1x128xf32, #tpu.memory_space<vmem>>, vector<1x128xf32>
    %5 = vector.broadcast %4 : vector<1x128xf32> to vector<256x128xf32>
    %6 = arith.addf %3, %5 : vector<256x128xf32>
    %c0_5 = arith.constant 0 : index
    %c0_6 = arith.constant 0 : index
    %7 = vector.load %arg5[%c0_5, %c0_6] : memref<256x128xf32, #tpu.memory_space<vmem>>, vector<256x128xf32>
    tpu.vector_store %arg5[%c0_5, %c0_6], %6 {strides = array<i32>} : memref<256x128xf32, #tpu.memory_space<vmem>>, vector<256x128xf32>,
    %8 = vector.extract_strided_slice %2 {offsets = [0, 128], sizes = [256, 128], strides = [1, 1]} : vector<256x256xf32> to vector<256x128xf32>
    %9 = arith.truncf %8 : vector<256x128xf32> to vector<256x128xbf16>
    %c0_7 = arith.constant 0 : index
    %c0_8 = arith.constant 0 : index
    %10 = vector.load %arg4[%c0_7, %c0_8] : memref<256x128xbf16, #tpu.memory_space<vmem>>, vector<256x128xbf16>
    tpu.vector_store %arg4[%c0_7, %c0_8], %9 {strides = array<i32>} : memref<256x128xbf16, #tpu.memory_space<vmem>>, vector<256x128xbf16>,
    return
  }
  func.func @transform_0(%arg0: i32) -> (i32, i32) {
    %c0_i32 = arith.constant 0 : i32
    %c0_i32_0 = arith.constant 0 : i32
    return %arg0, %c0_i32 : i32, i32
  }
  func.func @transform_1(%arg0: i32) -> (i32, i32) {
    %c0_i32 = arith.constant 0 : i32
    %c0_i32_0 = arith.constant 0 : i32
    %c0_i32_1 = arith.constant 0 : i32
    return %c0_i32, %c0_i32_0 : i32, i32
  }
  func.func @transform_2(%arg0: i32) -> (i32, i32) {
    %c0_i32 = arith.constant 0 : i32
    %c0_i32_0 = arith.constant 0 : i32
    %c0_i32_1 = arith.constant 0 : i32
    return %c0_i32, %c0_i32_0 : i32, i32
  }
  func.func @transform_3(%arg0: i32) -> (i32, i32) {
    %c0_i32 = arith.constant 0 : i32
    %c0_i32_0 = arith.constant 0 : i32
    return %arg0, %c0_i32 : i32, i32
  }
  func.func @transform_4(%arg0: i32) -> (i32, i32) {
    %c0_i32 = arith.constant 0 : i32
    %c0_i32_0 = arith.constant 0 : i32
    return %arg0, %c0_i32 : i32, i32
  }
}

</mosaic_0001>

<bundles_post_ra>
// kernel: tpu_custom_call.1
= control target key start
LH: loop header
LB: loop body
LE: loop exit
PB: predicated region body
PF: predicated region fallthrough
CT: control target
= control target key end

     0   :  { %10 = vsyncpa [#allocation3], 0  ;;  %s1185_s0 = inlined_call_operand.hbm [shape: bf16[256,128], index: 0, kind: input, shape index: {}]   ;;  %s1186_s1 = inlined_call_operand.hbm [shape: bf16[128,256], index: 1, kind: input, shape index: {}]   ;;  %s1187_s2 = inlined_call_operand.vmem [shape: f32[1,128], index: 2, kind: input, shape index: {}]   ;;  %s1188_s3 = inlined_call_operand.hbm [shape: bf16[256,128], index: 3, kind: output, shape index: {0}]   ;;  %s1189_s4 = inlined_call_operand.hbm [shape: f32[256,128], index: 4, kind: output, shape index: {1}]  }
   0x1   :  { %11 = vsyncpa [#allocation6], 0 }
   0x2   :  { %12 = vsyncpa [#allocation4], 0 }
   0x3   :  { %13 = vsyncpa [#allocation9], 0  ;;  %s1074_s15 = smov [#allocation2]  }
   0x4   :  { %s19_s16 = sshll.u32 %s1074_s15, 4  ;;  %s20_s16 = int_to_ptr.vmem [resolvable:$true] %s19_s16 }
   0x5   :  { %s994_s17 = scalar_lea.vmem %s20_s16, 2048  ;;  %p999_p1 = scmp.lt.s32.totalorder %s20_s16, %s20_s16 }
   0x6   :  { %p995_p0 = scmp.ne.s32.totalorder %s20_s16, %s994_s17  ;;  %p1000_p2 = scmp.lt.s32.totalorder %s994_s17, %s994_s17 }
   0x8   :  { %p1001_p3 = por %p1000_p2, %p999_p1 }
   0xa   :  { %p1002_p4 = pnand %p1001_p3, %p995_p0 }
   0xc   :  { %1005 = shalt.err (!%p1002_p4)
}
   0xd   :  { %s1075_s18 = smov 64   ;;  %s1076_s19 = smov 4  }
   0xe   :  { %25 = dma.hbm_to_vmem [thread:$0]  %s1185_s0, 2048, %s20_s16, [#allocation3], %s1075_s18, %s1075_s18, %s1076_s19  }
   0xf   :  { %s1077_s22 = smov [#allocation5]  }
  0x10   :  { %s31_s23 = sshll.u32 %s1077_s22, 4  ;;  %s32_s23 = int_to_ptr.vmem [resolvable:$true] %s31_s23 }
  0x11   :  { %s1014_s24 = scalar_lea.vmem %s32_s23, 2048  ;;  %p1019_p6 = scmp.lt.s32.totalorder %s32_s23, %s32_s23 }
  0x12   :  { %p1015_p5 = scmp.ne.s32.totalorder %s32_s23, %s1014_s24  ;;  %p1020_p7 = scmp.lt.s32.totalorder %s1014_s24, %s1014_s24 }
  0x14   :  { %p1021_p8 = por %p1020_p7, %p1019_p6 }
  0x16   :  { %p1022_p9 = pnand %p1021_p8, %p1015_p5 }
  0x18   :  { %1025 = shalt.err (!%p1022_p9)
}
  0x19   :  { %s1078_s25 = smov 128   ;;  %s1079_s26 = smov 8  }
  0x1a   :  { %37 = dma.hbm_to_vmem [thread:$0]  %s1186_s1, 2048, %s32_s23, [#allocation6], %s1078_s25, %s1078_s25, %s1079_s26  }
  0x1b   :  { %1066 = dma.done.wait [#allocation3], 2048  }
  0x1c   :  { %1067 = vsyncadd [#allocation3], 4294965248 }
  0x1d   :  { %1068 = dma.done.wait [#allocation6], 2048  }
  0x1e   :  { %1069 = vsyncadd [#allocation6], 4294965248  ;;  %v1080_v0 = vmov 0   ;;  %v946_v1 = vld [vmem:[#allocation5 + $0x74] ss:$8 sps:$4 sm:$0xff]   ;;  %v970_v17 = vld [vmem:[#allocation2] sm:$0xff]  }
  0x1f   :  { %303 = vmatprep.mubr.bf16.mxu0 %v1080_v0  ;;  %383 = vmatprep.mubr.bf16.mxu1 %v1080_v0  ;;  %v948_v2 = vld [vmem:[#allocation5 + $0x70] ss:$8 sps:$4 sm:$0xff]   ;;  %v949_v3 = vld [vmem:[#allocation5 + $0x64] ss:$8 sps:$4 sm:$0xff]   ;;  %v951_v4 = vld [vmem:[#allocation5 + $0x60] ss:$8 sps:$4 sm:$0xff]  }
  0x20   :  { %271 = vmatprep.subr.bf16.mxu0 %v946_v1  ;;  %921 = vmatprep.subr.bf16.mxu1 %v946_v1  ;;  %v952_v5 = vld [vmem:[#allocation5 + $0x54] ss:$8 sps:$4 sm:$0xff]   ;;  %v954_v6 = vld [vmem:[#allocation5 + $0x50] ss:$8 sps:$4 sm:$0xff]   ;;  %v955_v7 = vld [vmem:[#allocation5 + $0x44] ss:$8 sps:$4 sm:$0xff]  }
  0x21   :  { %272 = vmatpush1.bf16.msra.mxu0 %v948_v2  ;;  %929 = vmatpush1.bf16.msra.mxu1 %v948_v2  ;;  %v957_v8 = vld [vmem:[#allocation5 + $0x40] ss:$8 sps:$4 sm:$0xff]   ;;  %v958_v9 = vld [vmem:[#allocation5 + $0x34] ss:$8 sps:$4 sm:$0xff]   ;;  %v960_v10 = vld [vmem:[#allocation5 + $0x30] ss:$8 sps:$4 sm:$0xff]  }
  0x22   :  { %273 = vmatprep.subr.bf16.mxu0 %v949_v3  ;;  %922 = vmatprep.subr.bf16.mxu1 %v949_v3  ;;  %v961_v11 = vld [vmem:[#allocation5 + $0x24] ss:$8 sps:$4 sm:$0xff]   ;;  %v963_v12 = vld [vmem:[#allocation5 + $0x20] ss:$8 sps:$4 sm:$0xff]   ;;  %v964_v13 = vld [vmem:[#allocation5 + $0x14] ss:$8 sps:$4 sm:$0xff]  }
  0x23   :  { %v966_v14 = vld [vmem:[#allocation5 + $0x10] ss:$8 sps:$4 sm:$0xff]   ;;  %v967_v15 = vld [vmem:[#allocation5 + $0x4] ss:$8 sps:$4 sm:$0xff]   ;;  %v969_v16 = vld [vmem:[#allocation5] ss:$8 sps:$4 sm:$0xff]  }
  0x24   :  { %v971_v18 = vld [vmem:[#allocation2 + $0x40] sm:$0xff]   ;;  %v972_v19 = vld [vmem:[#allocation2 + $0x8] sm:$0xff]   ;;  %v974_v21 = vld [vmem:[#allocation2 + $0x10] sm:$0xff]   ;;  %s1082_s30 = smov [#allocation7]  }
  0x25   :  { %274 = vmatpush1.bf16.msra.mxu0 %v951_v4  ;;  %930 = vmatpush1.bf16.msra.mxu1 %v951_v4  ;;  %v973_v20 = vld [vmem:[#allocation2 + $0x48] sm:$0xff]   ;;  %v975_v22 = vld [vmem:[#allocation2 + $0x50] sm:$0xff]   ;;  %v976_v23 = vld [vmem:[#allocation2 + $0x18] sm:$0xff]   ;;  %s700_s5 = sshll.u32 %s1082_s30, 4  ;;  %s701_s5 = int_to_ptr.vmem [resolvable:$true] %s700_s5 }
  0x26   :  { %275 = vmatprep.subr.bf16.mxu0 %v952_v5  ;;  %923 = vmatprep.subr.bf16.mxu1 %v952_v5  ;;  %v977_v24 = vld [vmem:[#allocation2 + $0x58] sm:$0xff]   ;;  %v978_v25 = vld [vmem:[#allocation2 + $0x20] sm:$0xff]   ;;  %v980_v27 = vld [vmem:[#allocation2 + $0x28] sm:$0xff]  }
  0x27   :  { %v979_v26 = vld [vmem:[#allocation2 + $0x60] sm:$0xff]   ;;  %v981_v28 = vld [vmem:[#allocation2 + $0x68] sm:$0xff]   ;;  %v982_v29 = vld [vmem:[#allocation2 + $0x30] sm:$0xff]  }
  0x28   :  { %v983_v30 = vld [vmem:[#allocation2 + $0x70] sm:$0xff]   ;;  %v984_v31 = vld [vmem:[#allocation2 + $0x38] sm:$0xff]   ;;  %v1139_v33 = vld [vmem:[%s1187_s2] ss:$0 sm:$0xff]  ;;  %s1081_s2 = smov [#allocation8]  }
  0x29   :  { %276 = vmatpush1.bf16.msra.mxu0 %v954_v6  ;;  %931 = vmatpush1.bf16.msra.mxu1 %v954_v6  ;;  %v985_v32 = vld [vmem:[#allocation2 + $0x78] sm:$0xff]   ;;  %s712_s29 = sshll.u32 %s1081_s2, 4  ;;  %s713_s29 = int_to_ptr.vmem [resolvable:$true] %s712_s29 }
  0x2a   :  { %277 = vmatprep.subr.bf16.mxu0 %v955_v7  ;;  %924 = vmatprep.subr.bf16.mxu1 %v955_v7  ;;  %s1026_s6 = scalar_lea.vmem %s713_s29, 4096  ;;  %p1031_p11 = scmp.lt.s32.totalorder %s713_s29, %s713_s29 }
  0x2b   :  { %p1027_p10 = scmp.ne.s32.totalorder %s713_s29, %s1026_s6  ;;  %p1032_p12 = scmp.lt.s32.totalorder %s1026_s6, %s1026_s6 }
  0x2d   :  { %278 = vmatpush1.bf16.msra.mxu0 %v957_v8  ;;  %932 = vmatpush1.bf16.msra.mxu1 %v957_v8  ;;  %p1033_p13 = por %p1032_p12, %p1031_p11 }
  0x2e   :  { %279 = vmatprep.subr.bf16.mxu0 %v958_v9  ;;  %925 = vmatprep.subr.bf16.mxu1 %v958_v9 }
  0x2f   :  { %p1034_p0 = pnand %p1033_p13, %p1027_p10 }
  0x31   :  { %280 = vmatpush1.bf16.msra.mxu0 %v960_v10  ;;  %933 = vmatpush1.bf16.msra.mxu1 %v960_v10 }
  0x32   :  { %281 = vmatprep.subr.bf16.mxu0 %v961_v11  ;;  %926 = vmatprep.subr.bf16.mxu1 %v961_v11 }
  0x35   :  { %282 = vmatpush1.bf16.msra.mxu0 %v963_v12  ;;  %934 = vmatpush1.bf16.msra.mxu1 %v963_v12 }
  0x36   :  { %283 = vmatprep.subr.bf16.mxu0 %v964_v13  ;;  %927 = vmatprep.subr.bf16.mxu1 %v964_v13 }
  0x39   :  { %284 = vmatpush1.bf16.msra.mxu0 %v966_v14  ;;  %935 = vmatpush1.bf16.msra.mxu1 %v966_v14 }
  0x3a   :  { %285 = vmatprep.subr.bf16.mxu0 %v967_v15  ;;  %928 = vmatprep.subr.bf16.mxu1 %v967_v15 }
  0x3d   :  { %286 = vmatpush1.bf16.msra.mxu0 %v969_v16  ;;  %936 = vmatpush1.bf16.msra.mxu1 %v969_v16 }
  0x40   :  { %304 = vmatmul.mubr.bf16.vlgmr.msra.gmra.mxu0 %v970_v17  ;;  %384 = vmatmul.mubr.bf16.vlgmr.msra.gmra.mxu1 %v971_v18 }
  0x41   :  { %313 = vmatprep.mubr.bf16.mxu0 %v1080_v0  ;;  %393 = vmatprep.mubr.bf16.mxu1 %v1080_v0 }
  0x48   :  { %314 = vmatmul.mubr.bf16.gmra.mxu0 %v972_v19  ;;  %394 = vmatmul.mubr.bf16.gmra.mxu1 %v973_v20 }
  0x49   :  { %323 = vmatprep.mubr.bf16.mxu0 %v1080_v0  ;;  %403 = vmatprep.mubr.bf16.mxu1 %v1080_v0 }
  0x50   :  { %324 = vmatmul.mubr.bf16.gmra.mxu0 %v974_v21  ;;  %404 = vmatmul.mubr.bf16.gmra.mxu1 %v975_v22 }
  0x51   :  { %333 = vmatprep.mubr.bf16.mxu0 %v1080_v0  ;;  %413 = vmatprep.mubr.bf16.mxu1 %v1080_v0 }
  0x58   :  { %334 = vmatmul.mubr.bf16.gmra.mxu0 %v976_v23  ;;  %414 = vmatmul.mubr.bf16.gmra.mxu1 %v977_v24 }
  0x59   :  { %343 = vmatprep.mubr.bf16.mxu0 %v1080_v0  ;;  %423 = vmatprep.mubr.bf16.mxu1 %v1080_v0 }
  0x60   :  { %344 = vmatmul.mubr.bf16.gmra.mxu0 %v978_v25  ;;  %424 = vmatmul.mubr.bf16.gmra.mxu1 %v979_v26 }
  0x61   :  { %353 = vmatprep.mubr.bf16.mxu0 %v1080_v0  ;;  %433 = vmatprep.mubr.bf16.mxu1 %v1080_v0 }
  0x68   :  { %354 = vmatmul.mubr.bf16.gmra.mxu0 %v980_v27  ;;  %434 = vmatmul.mubr.bf16.gmra.mxu1 %v981_v28 }
  0x69   :  { %363 = vmatprep.mubr.bf16.mxu0 %v1080_v0  ;;  %443 = vmatprep.mubr.bf16.mxu1 %v1080_v0 }
  0x70   :  { %364 = vmatmul.mubr.bf16.gmra.mxu0 %v982_v29  ;;  %444 = vmatmul.mubr.bf16.gmra.mxu1 %v983_v30 }
  0x71   :  { %373 = vmatprep.mubr.bf16.mxu0 %v1080_v0  ;;  %453 = vmatprep.mubr.bf16.mxu1 %v1080_v0 }
  0x78   :  { %374 = vmatmul.mubr.bf16.gmra.mxu0 %v984_v31  ;;  %454 = vmatmul.mubr.bf16.gmra.mxu1 %v985_v32 }
 0x100   :  { %v305_v34 = vpop.f32.mrf.mxu0  ;;  %v385_v35 = vpop.f32.mrf.mxu1 }
 0x101   :  { %v471_v36 = vadd.f32 %v1139_v33, %v305_v34  ;;  %v487_v37 = vadd.f32 %v1139_v33, %v385_v35 }
 0x102   :  { %v307_v38 = vpop.f32.mrf.mxu0  ;;  %v387_v39 = vpop.f32.mrf.mxu1 }
 0x103   :  { %503 = vst [vmem:[#allocation8] sm:$0xff] %v471_v36  ;;  %519 = vst [vmem:[#allocation8 + $0x80] sm:$0xff] %v487_v37 }
 0x104   :  { %v309_v40 = vpop.f32.mrf.mxu0  ;;  %v389_v41 = vpop.f32.mrf.mxu1 }
 0x105   :  { %v472_v42 = vadd.f32 %v1139_v33, %v309_v40  ;;  %v488_v43 = vadd.f32 %v1139_v33, %v389_v41 }
 0x106   :  { %v311_v44 = vpop.f32.mrf.mxu0  ;;  %v391_v45 = vpop.f32.mrf.mxu1 }
 0x107   :  { %504 = vst [vmem:[#allocation8 + $0x8] sm:$0xff] %v472_v42  ;;  %520 = vst [vmem:[#allocation8 + $0x88] sm:$0xff] %v488_v43  ;;  %v829_v46 = vpack.c.bf16 %v311_v44, %v307_v38  ;;  %v869_v47 = vpack.c.bf16 %v391_v45, %v387_v39 }
 0x108   :  { %v315_v48 = vpop.f32.mrf.mxu0  ;;  %v395_v49 = vpop.f32.mrf.mxu1 }
 0x109   :  { %830 = vst [vmem:[#allocation7] sm:$0xff] %v829_v46   ;;  %913 = vst [vmem:[#allocation7 + $0x40] sm:$0xff] %v869_v47   ;;  %v473_v50 = vadd.f32 %v1139_v33, %v315_v48  ;;  %v489_v51 = vadd.f32 %v1139_v33, %v395_v49 }
 0x10a   :  { %v317_v52 = vpop.f32.mrf.mxu0  ;;  %v397_v53 = vpop.f32.mrf.mxu1 }
 0x10b   :  { %505 = vst [vmem:[#allocation8 + $0x10] sm:$0xff] %v473_v50  ;;  %521 = vst [vmem:[#allocation8 + $0x90] sm:$0xff] %v489_v51 }
 0x10c   :  { %v319_v54 = vpop.f32.mrf.mxu0  ;;  %v399_v55 = vpop.f32.mrf.mxu1 }
 0x10d   :  { %v474_v56 = vadd.f32 %v1139_v33, %v319_v54  ;;  %v490_v57 = vadd.f32 %v1139_v33, %v399_v55 }
 0x10e   :  { %v321_v58 = vpop.f32.mrf.mxu0  ;;  %v401_v59 = vpop.f32.mrf.mxu1 }
 0x10f   :  { %506 = vst [vmem:[#allocation8 + $0x18] sm:$0xff] %v474_v56  ;;  %522 = vst [vmem:[#allocation8 + $0x98] sm:$0xff] %v490_v57  ;;  %v834_v60 = vpack.c.bf16 %v321_v58, %v317_v52  ;;  %v874_v61 = vpack.c.bf16 %v401_v59, %v397_v53 }
 0x110   :  { %v325_v62 = vpop.f32.mrf.mxu0  ;;  %v405_v63 = vpop.f32.mrf.mxu1 }
 0x111   :  { %906 = vst [vmem:[#allocation7 + $0x8] sm:$0xff] %v834_v60   ;;  %914 = vst [vmem:[#allocation7 + $0x48] sm:$0xff] %v874_v61   ;;  %v475_v0 = vadd.f32 %v1139_v33, %v325_v62  ;;  %v491_v1 = vadd.f32 %v1139_v33, %v405_v63 }
 0x112   :  { %v327_v2 = vpop.f32.mrf.mxu0  ;;  %v407_v3 = vpop.f32.mrf.mxu1 }
 0x113   :  { %507 = vst [vmem:[#allocation8 + $0x20] sm:$0xff] %v475_v0  ;;  %523 = vst [vmem:[#allocation8 + $0xa0] sm:$0xff] %v491_v1 }
 0x114   :  { %v329_v4 = vpop.f32.mrf.mxu0  ;;  %v409_v5 = vpop.f32.mrf.mxu1 }
 0x115   :  { %v476_v6 = vadd.f32 %v1139_v33, %v329_v4  ;;  %v492_v7 = vadd.f32 %v1139_v33, %v409_v5 }
 0x116   :  { %v331_v8 = vpop.f32.mrf.mxu0  ;;  %v411_v9 = vpop.f32.mrf.mxu1 }
 0x117   :  { %508 = vst [vmem:[#allocation8 + $0x28] sm:$0xff] %v476_v6  ;;  %524 = vst [vmem:[#allocation8 + $0xa8] sm:$0xff] %v492_v7  ;;  %v839_v10 = vpack.c.bf16 %v331_v8, %v327_v2  ;;  %v879_v11 = vpack.c.bf16 %v411_v9, %v407_v3 }
 0x118   :  { %v335_v12 = vpop.f32.mrf.mxu0  ;;  %v415_v13 = vpop.f32.mrf.mxu1 }
 0x119   :  { %907 = vst [vmem:[#allocation7 + $0x10] sm:$0xff] %v839_v10   ;;  %915 = vst [vmem:[#allocation7 + $0x50] sm:$0xff] %v879_v11   ;;  %v477_v14 = vadd.f32 %v1139_v33, %v335_v12  ;;  %v493_v15 = vadd.f32 %v1139_v33, %v415_v13 }
 0x11a   :  { %v337_v16 = vpop.f32.mrf.mxu0  ;;  %v417_v17 = vpop.f32.mrf.mxu1 }
 0x11b   :  { %509 = vst [vmem:[#allocation8 + $0x30] sm:$0xff] %v477_v14  ;;  %525 = vst [vmem:[#allocation8 + $0xb0] sm:$0xff] %v493_v15 }
 0x11c   :  { %v339_v18 = vpop.f32.mrf.mxu0  ;;  %v419_v19 = vpop.f32.mrf.mxu1 }
 0x11d   :  { %v478_v20 = vadd.f32 %v1139_v33, %v339_v18  ;;  %v494_v21 = vadd.f32 %v1139_v33, %v419_v19 }
 0x11e   :  { %v341_v22 = vpop.f32.mrf.mxu0  ;;  %v421_v23 = vpop.f32.mrf.mxu1 }
 0x11f   :  { %510 = vst [vmem:[#allocation8 + $0x38] sm:$0xff] %v478_v20  ;;  %526 = vst [vmem:[#allocation8 + $0xb8] sm:$0xff] %v494_v21  ;;  %v844_v24 = vpack.c.bf16 %v341_v22, %v337_v16  ;;  %v884_v25 = vpack.c.bf16 %v421_v23, %v417_v17 }
 0x120   :  { %v345_v26 = vpop.f32.mrf.mxu0  ;;  %v425_v27 = vpop.f32.mrf.mxu1 }
 0x121   :  { %908 = vst [vmem:[#allocation7 + $0x18] sm:$0xff] %v844_v24   ;;  %916 = vst [vmem:[#allocation7 + $0x58] sm:$0xff] %v884_v25   ;;  %v479_v28 = vadd.f32 %v1139_v33, %v345_v26  ;;  %v495_v29 = vadd.f32 %v1139_v33, %v425_v27 }
 0x122   :  { %v347_v30 = vpop.f32.mrf.mxu0  ;;  %v427_v31 = vpop.f32.mrf.mxu1 }
 0x123   :  { %511 = vst [vmem:[#allocation8 + $0x40] sm:$0xff] %v479_v28  ;;  %527 = vst [vmem:[#allocation8 + $0xc0] sm:$0xff] %v495_v29 }
 0x124   :  { %v349_v32 = vpop.f32.mrf.mxu0  ;;  %v429_v34 = vpop.f32.mrf.mxu1 }
 0x125   :  { %v480_v35 = vadd.f32 %v1139_v33, %v349_v32  ;;  %v496_v36 = vadd.f32 %v1139_v33, %v429_v34 }
 0x126   :  { %v351_v37 = vpop.f32.mrf.mxu0  ;;  %v431_v38 = vpop.f32.mrf.mxu1 }
 0x127   :  { %512 = vst [vmem:[#allocation8 + $0x48] sm:$0xff] %v480_v35  ;;  %528 = vst [vmem:[#allocation8 + $0xc8] sm:$0xff] %v496_v36  ;;  %v849_v39 = vpack.c.bf16 %v351_v37, %v347_v30  ;;  %v889_v40 = vpack.c.bf16 %v431_v38, %v427_v31 }
 0x128   :  { %v355_v41 = vpop.f32.mrf.mxu0  ;;  %v435_v42 = vpop.f32.mrf.mxu1 }
 0x129   :  { %909 = vst [vmem:[#allocation7 + $0x20] sm:$0xff] %v849_v39   ;;  %917 = vst [vmem:[#allocation7 + $0x60] sm:$0xff] %v889_v40   ;;  %v481_v43 = vadd.f32 %v1139_v33, %v355_v41  ;;  %v497_v44 = vadd.f32 %v1139_v33, %v435_v42 }
 0x12a   :  { %v357_v45 = vpop.f32.mrf.mxu0  ;;  %v437_v46 = vpop.f32.mrf.mxu1 }
 0x12b   :  { %513 = vst [vmem:[#allocation8 + $0x50] sm:$0xff] %v481_v43  ;;  %529 = vst [vmem:[#allocation8 + $0xd0] sm:$0xff] %v497_v44 }
 0x12c   :  { %v359_v47 = vpop.f32.mrf.mxu0  ;;  %v439_v48 = vpop.f32.mrf.mxu1 }
 0x12d   :  { %v482_v49 = vadd.f32 %v1139_v33, %v359_v47  ;;  %v498_v50 = vadd.f32 %v1139_v33, %v439_v48 }
 0x12e   :  { %v361_v51 = vpop.f32.mrf.mxu0  ;;  %v441_v52 = vpop.f32.mrf.mxu1 }
 0x12f   :  { %514 = vst [vmem:[#allocation8 + $0x58] sm:$0xff] %v482_v49  ;;  %530 = vst [vmem:[#allocation8 + $0xd8] sm:$0xff] %v498_v50  ;;  %v854_v53 = vpack.c.bf16 %v361_v51, %v357_v45  ;;  %v894_v54 = vpack.c.bf16 %v441_v52, %v437_v46 }
 0x130   :  { %v365_v55 = vpop.f32.mrf.mxu0  ;;  %v445_v56 = vpop.f32.mrf.mxu1 }
 0x131   :  { %910 = vst [vmem:[#allocation7 + $0x28] sm:$0xff] %v854_v53   ;;  %918 = vst [vmem:[#allocation7 + $0x68] sm:$0xff] %v894_v54   ;;  %v483_v57 = vadd.f32 %v1139_v33, %v365_v55  ;;  %v499_v58 = vadd.f32 %v1139_v33, %v445_v56 }
 0x132   :  { %v367_v59 = vpop.f32.mrf.mxu0  ;;  %v447_v60 = vpop.f32.mrf.mxu1 }
 0x133   :  { %515 = vst [vmem:[#allocation8 + $0x60] sm:$0xff] %v483_v57  ;;  %531 = vst [vmem:[#allocation8 + $0xe0] sm:$0xff] %v499_v58 }
 0x134   :  { %v369_v61 = vpop.f32.mrf.mxu0  ;;  %v449_v62 = vpop.f32.mrf.mxu1 }
 0x135   :  { %v484_v63 = vadd.f32 %v1139_v33, %v369_v61  ;;  %v500_v0 = vadd.f32 %v1139_v33, %v449_v62 }
 0x136   :  { %v371_v1 = vpop.f32.mrf.mxu0  ;;  %v451_v2 = vpop.f32.mrf.mxu1 }
 0x137   :  { %516 = vst [vmem:[#allocation8 + $0x68] sm:$0xff] %v484_v63  ;;  %532 = vst [vmem:[#allocation8 + $0xe8] sm:$0xff] %v500_v0  ;;  %v859_v3 = vpack.c.bf16 %v371_v1, %v367_v59  ;;  %v899_v4 = vpack.c.bf16 %v451_v2, %v447_v60 }
 0x138   :  { %v375_v5 = vpop.f32.mrf.mxu0  ;;  %v455_v6 = vpop.f32.mrf.mxu1 }
 0x139   :  { %911 = vst [vmem:[#allocation7 + $0x30] sm:$0xff] %v859_v3   ;;  %919 = vst [vmem:[#allocation7 + $0x70] sm:$0xff] %v899_v4   ;;  %v485_v7 = vadd.f32 %v1139_v33, %v375_v5  ;;  %v501_v8 = vadd.f32 %v1139_v33, %v455_v6 }
 0x13a   :  { %v377_v9 = vpop.f32.mrf.mxu0  ;;  %v457_v10 = vpop.f32.mrf.mxu1 }
 0x13b   :  { %517 = vst [vmem:[#allocation8 + $0x70] sm:$0xff] %v485_v7  ;;  %533 = vst [vmem:[#allocation8 + $0xf0] sm:$0xff] %v501_v8 }
 0x13c   :  { %v379_v11 = vpop.f32.mrf.mxu0  ;;  %v459_v12 = vpop.f32.mrf.mxu1 }
 0x13d   :  { %v486_v13 = vadd.f32 %v1139_v33, %v379_v11  ;;  %v502_v14 = vadd.f32 %v1139_v33, %v459_v12 }
 0x13e   :  { %v381_v15 = vpop.f32.mrf.mxu0  ;;  %v461_v16 = vpop.f32.mrf.mxu1 }
 0x13f   :  { %518 = vst [vmem:[#allocation8 + $0x78] sm:$0xff] %v486_v13  ;;  %534 = vst [vmem:[#allocation8 + $0xf8] sm:$0xff] %v502_v14  ;;  %v864_v17 = vpack.c.bf16 %v381_v15, %v377_v9  ;;  %v904_v18 = vpack.c.bf16 %v461_v16, %v457_v10 }
 0x140   :  { %1037 = shalt.err (!%p1034_p0)
}
 0x141   :  { %718 = dma.vmem_to_hbm [thread:$0]  %s713_s29, 4096, %s1189_s4, [#allocation9], %s1078_s25, %s1078_s25, %s1079_s26   ;;  %912 = vst [vmem:[#allocation7 + $0x38] sm:$0xff] %v864_v17   ;;  %920 = vst [vmem:[#allocation7 + $0x78] sm:$0xff] %v904_v18  }
 0x142   :  { %s1046_s9 = scalar_lea.vmem %s701_s5, 2048  ;;  %p1051_p2 = scmp.lt.s32.totalorder %s701_s5, %s701_s5 }
 0x143   :  { %p1047_p1 = scmp.ne.s32.totalorder %s701_s5, %s1046_s9  ;;  %p1052_p3 = scmp.lt.s32.totalorder %s1046_s9, %s1046_s9 }
 0x145   :  { %p1053_p4 = por %p1052_p3, %p1051_p2 }
 0x147   :  { %p1054_p5 = pnand %p1053_p4, %p1047_p1 }
 0x149   :  { %1057 = shalt.err (!%p1054_p5)
}
 0x14a   :  { %706 = dma.vmem_to_hbm [thread:$0]  %s701_s5, 2048, %s1188_s3, [#allocation4], %s1075_s18, %s1075_s18, %s1076_s19  }
 0x14b   :  { %1070 = dma.done.wait [#allocation4], 2048  }
 0x14c   :  { %1071 = vsyncadd [#allocation4], 4294965248 }
 0x14d   :  { %1072 = dma.done.wait [#allocation9], 4096  }
 0x14e   :  { %1073 = vsyncadd [#allocation9], 4294963200 }
 0x14f   :  { %725 = vsyncpa [#allocation3], 1 }
 0x150   :  { %726 = vsyncpa [#allocation6], 1 }
 0x151   :  { %727 = vsyncpa [#allocation4], 1 }
 0x152   :  { %728 = vsyncpa [#allocation9], 1 }

</bundles_post_ra>
